<compile_context>
chip_gen: v7x
topology: tpu7x:2x2x1
jax: 0.10.0
libtpu: 0.0.40
codegen_flags: <defaults>
</compile_context>

<pallas_src>
import functools
import math

import jax
import jax.numpy as jnp
from jax.experimental import pallas as pl
from jax.experimental.pallas import tpu as pltpu

_LANES = 128
_ABS_MAX_TILE_ROWS = 16384   # absolute ceiling on rows per tile
_TEMP_F32_SLABS = 5          # headroom for compiler-materialized f32 temporaries
_PALLAS_MIN_ELEMS = 1 << 16  # below ~256 KiB HBM traffic, plain jnp.mean wins


def _round_up(x: int, m: int) -> int:
    return ((x + m - 1) // m) * m


def _row_align(itemsize: int) -> int:
    # Sub-32-bit dtypes pack 2/4 rows per sublane: keep tiles on packed-sublane
    # boundaries (f32 -> 8, bf16 -> 16, int8/fp8 -> 32 rows).
    return max(8, 32 // itemsize)


def _physical_vmem_bytes() -> int:
    try:
        info = pltpu.get_tpu_info()
        return int(getattr(info, "vmem_capacity_bytes", 64 << 20))
    except Exception:
        return 64 << 20  # conservative (v7x-sized) fallback


def _working_set_bytes(tile_rows: int, itemsize: int, acc_rows: int) -> int:
    inputs = 2 * 2 * tile_rows * _LANES * itemsize       # 2 inputs, double-buffered
    temps = _TEMP_F32_SLABS * tile_rows * _LANES * 4     # f32 elementwise temporaries
    acc = acc_rows * _LANES * 4
    return inputs + temps + acc + (1 << 20)              # + 1 MiB slack


def _pick_tile_rows(rows: int, itemsize: int) -> int:
    """Largest row tile whose pipelined working set fits a safe VMEM budget."""
    align = _row_align(itemsize)
    budget = min(int(0.6 * _physical_vmem_bytes()), 48 << 20)
    per_row = 2 * 2 * _LANES * itemsize + _TEMP_F32_SLABS * _LANES * 4
    cap = max(align, ((budget // per_row) // align) * align)
    cap = min(cap, _ABS_MAX_TILE_ROWS)
    return min(cap, _round_up(rows, align))


def _mse_kernel(a_ref, b_ref, o_ref, acc_ref, *,
                inv_n: float, rows: int, tile_rows: int, steps: int,
                acc_rows: int, needs_mask: bool):
    k = pl.program_id(1)  # reduction axis (innermost)

    @pl.when(k == 0)
    def _():
        acc_ref[...] = jnp.zeros_like(acc_ref)

    # Cast AFTER load: DMA stays at native width; math stays f32 (v5e-safe).
    d = a_ref[...].astype(jnp.float32) - b_ref[...].astype(jnp.float32)
    sq = d * d

    if needs_mask:
        # Static flag: only emitted when this shape actually has padded rows
        # (partial last tile and/or ghost blocks from the 2-way part split).
        blk = pl.program_id(0) * steps + k
        row_start = blk * tile_rows
        row_ids = jax.lax.broadcasted_iota(jnp.int32, (tile_rows, _LANES), 0)
        sq = jnp.where(row_start + row_ids < rows, sq, 0.0)

    # Fold the tile into a few-vreg accumulator: leading-dim reshape is free,
    # the axis-0 sum is pure VPU vreg adds (no XLU in the hot loop).
    acc_ref[...] += sq.reshape(tile_rows // acc_rows, acc_rows, _LANES).sum(axis=0)

    @pl.when(k == pl.num_programs(1) - 1)
    def _():
        # One cross-lane/sublane reduce per part; store lane-dense (unmasked vst).
        total = jnp.sum(acc_ref[...]) * inv_n
        o_ref[...] = jnp.full((8, _LANES), total, dtype=jnp.float32)


def _pallas_ok(n: int) -> bool:
    """Pure-reshape (copy-free) path requires a lane-dense (rows, 128) slab."""
    return n > 0 and n % _LANES == 0


def _pallas_mse(pred: jax.Array, targ: jax.Array) -> jax.Array:
    n = math.prod(pred.shape)
    # Pure reshape (no concatenate, no upcast): zero extra HBM traffic.
    pred2d = pred.reshape(-1, _LANES)
    targ2d = targ.reshape(-1, _LANES)
    rows = pred2d.shape[0]
    itemsize = max(pred2d.dtype.itemsize, targ2d.dtype.itemsize)

    acc_rows = _row_align(itemsize)                 # tile_rows is a multiple of this
    tile_rows = _pick_tile_rows(rows, itemsize)
    num_tiles = (rows + tile_rows - 1) // tile_rows

    # Always split >=2 tiles into 2 parts so v7x's two TensorCores each stream
    # half the rows (megacore shards the "parallel" axis); serial on v5e/v6e.
    num_parts = 2 if num_tiles >= 2 else 1
    steps = (num_tiles + num_parts - 1) // num_parts
    last_block = num_tiles - 1
    needs_mask = (num_parts * steps * tile_rows) != rows

    def in_index(p, k):
        # Clamp ghost blocks (odd tile counts) to the last real block; their
        # contribution is zeroed by the in-kernel row mask.
        return (jnp.minimum(p * steps + k, last_block), 0)

    kernel = functools.partial(
        _mse_kernel, inv_n=1.0 / float(n), rows=rows, tile_rows=tile_rows,
        steps=steps, acc_rows=acc_rows, needs_mask=needs_mask)

    partials = pl.pallas_call(
        kernel,
        out_shape=jax.ShapeDtypeStruct((num_parts * 8, _LANES), jnp.float32),
        grid_spec=pltpu.PrefetchScalarGridSpec(
            num_scalar_prefetch=0,
            grid=(num_parts, steps),
            in_specs=[
                pl.BlockSpec((tile_rows, _LANES), in_index),
                pl.BlockSpec((tile_rows, _LANES), in_index),
            ],
            out_specs=pl.BlockSpec((8, _LANES), lambda p, k: (p, 0)),
            scratch_shapes=[pltpu.VMEM((acc_rows, _LANES), jnp.float32)],
        ),
        compiler_params=pltpu.CompilerParams(
            dimension_semantics=("parallel", "arbitrary"),
            vmem_limit_bytes=max(
                32 << 20, _working_set_bytes(tile_rows, itemsize, acc_rows)),
        ),
    )(pred2d, targ2d)

    # Each per-part partial (already scaled by 1/n) sits at [p*8 + 0, 0].
    return jnp.sum(partials.reshape(num_parts, 8, _LANES)[:, 0, 0])


def debug_broadcast_mse(*inputs, force_pallas: bool = False) -> jax.Array:
    """JAX/Pallas equivalent of _DebugBroadCast(torch.nn.MSELoss())(*inputs)."""
    shapes = [tuple(x.shape) for x in inputs]
    print("DEBUG BROADCASTING shapes:", shapes)  # trace-time, as in the module
    for s in shapes:
        if not s == shapes[0]:
            raise ValueError("Broadcasting in loss shapes:", shapes)
    if len(inputs) != 2:
        # TODO(synk): generic `inner` modules other than MSELoss are not modeled.
        raise ValueError("MSE inner expects exactly (prediction, target).")

    pred, target = inputs
    n = math.prod(pred.shape)
    use_pallas = _pallas_ok(n) and (force_pallas or n >= _PALLAS_MIN_ELEMS)
    if not use_pallas:
        # Tiny or lane-ragged inputs: XLA's fused reduction wins; identical math.
        d = pred.astype(jnp.float32) - target.astype(jnp.float32)
        return jnp.mean(d * d)
    return _pallas_mse(pred, target)


if __name__ == "__main__":
    key = jax.random.PRNGKey(0)
    k1, k2, k3, k4 = jax.random.split(key, 4)

    # Primary check: NCHW inputs (batch=2, channels=4, spatial=16x16),
    # identical shapes; rows=16 -> exact single-tile path (no masking).
    x_shape = (2, 4, 16, 16)
    pred = jax.random.normal(k1, x_shape, dtype=jnp.float32)
    target = jax.random.normal(k2, x_shape, dtype=jnp.float32)
    loss = jax.block_until_ready(debug_broadcast_mse(pred, target, force_pallas=True))
    ref = jnp.mean((pred - target) ** 2)
    assert jnp.allclose(loss, ref, rtol=1e-5, atol=1e-6), (loss, ref)

    # Second check: rows=42 is not a multiple of the 8-row alignment -> the
    # tile is padded and the masked partial-tile path is exercised.
    y_shape = (3, 7, 16, 16)
    pred2 = jax.random.normal(k3, y_shape, dtype=jnp.float32)
    targ2 = jax.random.normal(k4, y_shape, dtype=jnp.float32)
    loss2 = jax.block_until_ready(debug_broadcast_mse(pred2, targ2, force_pallas=True))
    ref2 = jnp.mean((pred2 - targ2) ** 2)
    assert jnp.allclose(loss2, ref2, rtol=1e-5, atol=1e-6), (loss2, ref2)

    print("KERNEL_OK")
</pallas_src>

<mosaic_0001>
module attributes {stable_mosaic.version = 11 : i64} {
  func.func @_mse_kernel(%arg0: i32, %arg1: i32, %arg2: memref<16x128xf32, #tpu.memory_space<vmem>>, %arg3: memref<16x128xf32, #tpu.memory_space<vmem>>, %arg4: memref<8x128xf32, #tpu.memory_space<vmem>>, %arg5: memref<8x128xf32, #tpu.memory_space<vmem>>) attributes {dimension_semantics = [#tpu.dimension_semantics<parallel>, #tpu.dimension_semantics<arbitrary>], iteration_bounds = array<i64: 1, 1>, scalar_prefetch = 0 : i64, scratch_operands = 1 : i64, tpu.core_type = #tpu.core_type<tc>, window_params = [{transform_indices = @transform_0, window_bounds = array<i64: 16, 128>}, {transform_indices = @transform_1, window_bounds = array<i64: 16, 128>}, {transform_indices = @transform_2, window_bounds = array<i64: 8, 128>}]} {
    %c0_i32 = arith.constant 0 : i32
    %0 = arith.cmpi eq, %arg1, %c0_i32 : i32
    %1 = arith.extui %0 : i1 to i32
    %c0_i32_0 = arith.constant 0 : i32
    %2 = arith.cmpi ne, %1, %c0_i32_0 : i32
    scf.if %2 {
      %cst_10 = arith.constant 0.000000e+00 : f32
      %15 = vector.broadcast %cst_10 : f32 to vector<8x128xf32>
      %c0_11 = arith.constant 0 : index
      %c0_12 = arith.constant 0 : index
      %16 = vector.load %arg5[%c0_11, %c0_12] : memref<8x128xf32, #tpu.memory_space<vmem>>, vector<8x128xf32>
      tpu.vector_store %arg5[%c0_11, %c0_12], %15 {strides = array<i32>} : memref<8x128xf32, #tpu.memory_space<vmem>>, vector<8x128xf32>,
    } else {
    }
    %c0 = arith.constant 0 : index
    %c0_1 = arith.constant 0 : index
    %3 = vector.load %arg2[%c0, %c0_1] : memref<16x128xf32, #tpu.memory_space<vmem>>, vector<16x128xf32>
    %c0_2 = arith.constant 0 : index
    %c0_3 = arith.constant 0 : index
    %4 = vector.load %arg3[%c0_2, %c0_3] : memref<16x128xf32, #tpu.memory_space<vmem>>, vector<16x128xf32>
    %5 = arith.subf %3, %4 : vector<16x128xf32>
    %6 = arith.mulf %5, %5 : vector<16x128xf32>
    %c0_4 = arith.constant 0 : index
    %c0_5 = arith.constant 0 : index
    %7 = vector.load %arg5[%c0_4, %c0_5] : memref<8x128xf32, #tpu.memory_space<vmem>>, vector<8x128xf32>
    %8 = vector.shape_cast %6 : vector<16x128xf32> to vector<2x8x128xf32>
    %cst = arith.constant dense<0.000000e+00> : vector<8x128xf32>
    %9 = vector.multi_reduction <add>, %8, %cst [0] : vector<2x8x128xf32> to vector<8x128xf32>
    %10 = arith.addf %7, %9 : vector<8x128xf32>
    %c0_6 = arith.constant 0 : index
    %c0_7 = arith.constant 0 : index
    %11 = vector.load %arg5[%c0_6, %c0_7] : memref<8x128xf32, #tpu.memory_space<vmem>>, vector<8x128xf32>
    tpu.vector_store %arg5[%c0_6, %c0_7], %10 {strides = array<i32>} : memref<8x128xf32, #tpu.memory_space<vmem>>, vector<8x128xf32>,
    %c0_i32_8 = arith.constant 0 : i32
    %12 = arith.cmpi eq, %arg1, %c0_i32_8 : i32
    %13 = arith.extui %12 : i1 to i32
    %c0_i32_9 = arith.constant 0 : i32
    %14 = arith.cmpi ne, %13, %c0_i32_9 : i32
    scf.if %14 {
      %c0_10 = arith.constant 0 : index
      %c0_11 = arith.constant 0 : index
      %15 = vector.load %arg5[%c0_10, %c0_11] : memref<8x128xf32, #tpu.memory_space<vmem>>, vector<8x128xf32>
      %16 = vector.shape_cast %15 : vector<8x128xf32> to vector<1x8x128xf32>
      %cst_12 = arith.constant dense<0.000000e+00> : vector<1xf32>
      %17 = vector.multi_reduction <add>, %16, %cst_12 [1, 2] : vector<1x8x128xf32> to vector<1xf32>
      %18 = vector.shape_cast %17 : vector<1xf32> to vector<1x1x1xf32>
      %19 = vector.extract %18[0, 0, 0] : f32 from vector<1x1x1xf32>
      %cst_13 = arith.constant 4.8828125E-4 : f32
      %20 = arith.mulf %19, %cst_13 : f32
      %21 = vector.broadcast %20 : f32 to vector<8x128xf32>
      %c0_14 = arith.constant 0 : index
      %c0_15 = arith.constant 0 : index
      %22 = vector.load %arg4[%c0_14, %c0_15] : memref<8x128xf32, #tpu.memory_space<vmem>>, vector<8x128xf32>
      tpu.vector_store %arg4[%c0_14, %c0_15], %21 {strides = array<i32>} : memref<8x128xf32, #tpu.memory_space<vmem>>, vector<8x128xf32>,
    } else {
    }
    return
  }
  func.func @transform_0(%arg0: i32, %arg1: i32) -> (i32, i32) {
    %c1_i32 = arith.constant 1 : i32
    %0 = arith.muli %arg0, %c1_i32 : i32
    %1 = arith.addi %0, %arg1 : i32
    %c0_i32 = arith.constant 0 : i32
    %2 = arith.minsi %1, %c0_i32 : i32
    %c0_i32_0 = arith.constant 0 : i32
    %c0_i32_1 = arith.constant 0 : i32
    return %2, %c0_i32_0 : i32, i32
  }
  func.func @transform_1(%arg0: i32, %arg1: i32) -> (i32, i32) {
    %c1_i32 = arith.constant 1 : i32
    %0 = arith.muli %arg0, %c1_i32 : i32
    %1 = arith.addi %0, %arg1 : i32
    %c0_i32 = arith.constant 0 : i32
    %2 = arith.minsi %1, %c0_i32 : i32
    %c0_i32_0 = arith.constant 0 : i32
    %c0_i32_1 = arith.constant 0 : i32
    return %2, %c0_i32_0 : i32, i32
  }
  func.func @transform_2(%arg0: i32, %arg1: i32) -> (i32, i32) {
    %c0_i32 = arith.constant 0 : i32
    %c0_i32_0 = arith.constant 0 : i32
    return %arg0, %c0_i32 : i32, i32
  }
}

</mosaic_0001>

<bundles_post_ra>
// kernel: tpu_custom_call.1
= control target key start
LH: loop header
LB: loop body
LE: loop exit
PB: predicated region body
PF: predicated region fallthrough
CT: control target
= control target key end

     0   :  { %7 = vsyncpa [#allocation4], 0  ;;  %s248_s0 = inlined_call_operand.hbm [shape: f32[16,128], index: 0, kind: input, shape index: {}]   ;;  %s249_s1 = inlined_call_operand.hbm [shape: f32[16,128], index: 1, kind: input, shape index: {}]   ;;  %s250_s2 = inlined_call_operand.hbm [shape: f32[8,128], index: 2, kind: output, shape index: {}]  }
   0x1   :  { %8 = vsyncpa [#allocation7], 0 }
   0x2   :  { %9 = vsyncpa [#allocation5], 0  ;;  %s192_s9 = smov [#allocation3]   ;;  %s120_s13 = scalar_lea.hbm %s248_s0, 256 }
   0x3   :  { %s21_s10 = sshll.u32 %s192_s9, 4  ;;  %p121_p0 = scmp.ne.s32.totalorder %s248_s0, %s120_s13  ;;  %s22_s10 = int_to_ptr.vmem [resolvable:$true] %s21_s10 }
   0x4   :  { %p124_p1 = scmp.lt.u32.totalorder %s120_s13, %s248_s0 }
   0x6   :  { %p126_p2 = pnand %p124_p1, %p121_p0 }
   0x8   :  { %129 = shalt.err (!%p126_p2)
}
   0x9   :  { %s130_s18 = scalar_lea.vmem %s22_s10, 256  ;;  %p135_p4 = scmp.lt.s32.totalorder %s22_s10, %s22_s10 }
   0xa   :  { %p131_p3 = scmp.ne.s32.totalorder %s22_s10, %s130_s18  ;;  %p136_p5 = scmp.lt.s32.totalorder %s130_s18, %s130_s18 }
   0xc   :  { %p137_p6 = por %p136_p5, %p135_p4 }
   0xe   :  { %p138_p7 = pnand %p137_p6, %p131_p3 }
  0x10   :  { %141 = shalt.err (!%p138_p7)
}
  0x11   :  { %s193_s19 = smov 128   ;;  %s194_s20 = smov 8  }
  0x12   :  { %27 = dma.hbm_to_vmem [thread:$0]  %s248_s0, 256, %s22_s10, [#allocation4], %s193_s19, %s193_s19, %s194_s20  }
  0x13   :  { %s195_s23 = smov [#allocation6]   ;;  %s142_s27 = scalar_lea.hbm %s249_s1, 256 }
  0x14   :  { %s39_s24 = sshll.u32 %s195_s23, 4  ;;  %p143_p8 = scmp.ne.s32.totalorder %s249_s1, %s142_s27  ;;  %s40_s24 = int_to_ptr.vmem [resolvable:$true] %s39_s24 }
  0x15   :  { %p146_p9 = scmp.lt.u32.totalorder %s142_s27, %s249_s1 }
  0x17   :  { %p148_p10 = pnand %p146_p9, %p143_p8 }
  0x19   :  { %151 = shalt.err (!%p148_p10)
}
  0x1a   :  { %s152_s4 = scalar_lea.vmem %s40_s24, 256  ;;  %p157_p12 = scmp.lt.s32.totalorder %s40_s24, %s40_s24 }
  0x1b   :  { %p153_p11 = scmp.ne.s32.totalorder %s40_s24, %s152_s4  ;;  %p158_p13 = scmp.lt.s32.totalorder %s152_s4, %s152_s4 }
  0x1d   :  { %p159_p0 = por %p158_p13, %p157_p12 }
  0x1f   :  { %p160_p1 = pnand %p159_p0, %p153_p11 }
  0x21   :  { %163 = shalt.err (!%p160_p1)
}
  0x22   :  { %45 = dma.hbm_to_vmem [thread:$0]  %s249_s1, 256, %s40_s24, [#allocation7], %s193_s19, %s193_s19, %s194_s20  }
  0x23   :  { %186 = dma.done.wait [#allocation4], 256  }
  0x24   :  { %187 = vsyncadd [#allocation4], 4294967040 }
  0x25   :  { %188 = dma.done.wait [#allocation7], 256  }
  0x26   :  { %189 = vsyncadd [#allocation7], 4294967040  ;;  %v65_v0 = vld [vmem:[#allocation3] sm:$0xff]  ;;  %v66_v1 = vld [vmem:[#allocation3 + $0x8] sm:$0xff]  ;;  %s196_s1 = smov [#allocation8]  }
  0x27   :  { %v67_v2 = vld [vmem:[#allocation6] sm:$0xff]  ;;  %v68_v3 = vld [vmem:[#allocation6 + $0x8] sm:$0xff]  ;;  %s99_s6 = sshll.u32 %s196_s1, 4  ;;  %s100_s6 = int_to_ptr.vmem [resolvable:$true] %s99_s6 }
  0x28   :  { %v69_v4 = vsub.f32 %v65_v0, %v67_v2  ;;  %v70_v5 = vsub.f32 %v66_v1, %v68_v3  ;;  %s164_s9 = scalar_lea.vmem %s100_s6, 128  ;;  %p169_p3 = scmp.lt.s32.totalorder %s100_s6, %s100_s6 }
  0x29   :  { %p165_p2 = scmp.ne.s32.totalorder %s100_s6, %s164_s9  ;;  %p170_p4 = scmp.lt.s32.totalorder %s164_s9, %s164_s9 }
  0x2a   :  { %v71_v6 = vmul.f32 %v69_v4, %v69_v4  ;;  %v72_v7 = vmul.f32 %v70_v5, %v70_v5 }
  0x2b   :  { %p171_p5 = por %p170_p4, %p169_p3 }
  0x2c   :  { %v74_v8 = vadd.f32 %v72_v7, %v71_v6 }
  0x2d   :  { %p172_p6 = pnand %p171_p5, %p165_p2 }
  0x2e   :  { %81 = vadd.xlane.f32.xlu0 %v74_v8 }
  0xbb   :  { %v82_v9 = vpop.xlane.xlu0 %81 }
  0xbc   :  { %v83_v10 = vrot.slane %v82_v9, 4 }
  0xbe   :  { %v84_v11 = vadd.f32 %v83_v10, %v82_v9 }
  0xc0   :  { %v85_v12 = vrot.slane %v84_v11, 2 }
  0xc2   :  { %v86_v13 = vadd.f32 %v85_v12, %v84_v11 }
  0xc4   :  { %v87_v14 = vrot.slane %v86_v13, 1 }
  0xc6   :  { %v88_v15 = vadd.f32 %v87_v14, %v86_v13 }
  0xc8   :  { %113 = vpush %v88_v15 }
  0xf9   :  { %s114_s7 = spop %113 }
  0xfa   :  { %s90_s8 = smul.f32 0.00048828125, %s114_s7 }
  0xfc   :  { %v91_v16 = vstv %s90_s8 }
  0xfd   :  { %92 = vst [vmem:[#allocation8] sm:$0xff] %v91_v16 }
  0xfe   :  { %175 = shalt.err (!%p172_p6)
}
  0xff   :  { %s176_s12 = scalar_lea.hbm %s250_s2, 128 }
 0x100   :  { %p177_p7 = scmp.ne.s32.totalorder %s250_s2, %s176_s12  ;;  %p180_p8 = scmp.lt.u32.totalorder %s176_s12, %s250_s2 }
 0x102   :  { %p182_p9 = pnand %p180_p8, %p177_p7 }
 0x104   :  { %185 = shalt.err (!%p182_p9)
}
 0x105   :  { %102 = dma.vmem_to_hbm [thread:$0]  %s100_s6, 128, %s250_s2, [#allocation5]  }
 0x106   :  { %190 = dma.done.wait [#allocation5], 128  }
 0x107   :  { %191 = vsyncadd [#allocation5], 4294967168 }
 0x108   :  { %106 = vsyncpa [#allocation4], 1 }
 0x109   :  { %107 = vsyncpa [#allocation7], 1 }
 0x10a   :  { %108 = vsyncpa [#allocation5], 1 }

</bundles_post_ra>
